<compile_context>
chip_gen: v7x
topology: tpu7x:2x2x1
jax: 0.10.0
libtpu: 0.0.40
codegen_flags: <defaults>
</compile_context>

<pallas_src>
import functools

import jax
import jax.numpy as jnp
from jax.experimental import pallas as pl
from jax.experimental.pallas import tpu as pltpu

_LANE = 128
_SUBLANE = 8
_SINGLE_BUFFER_WEIGHTS = True   # flips to False at runtime if Buffered(1) unsupported


def _round_up(x, m):
    return (x + m - 1) // m * m


def _cdiv(a, b):
    return -(-a // b)


# ---------------------------------------------------------------------------
# Fused kernel: full layer chain + element-wise squared-error accumulation
# for one batch tile.  rest = (w0, b0, w1, b1, ..., o_ref).
# ---------------------------------------------------------------------------
def _sdae_fused_kernel(x_ref, *rest, acts, snapshot_at, slope, tile_m,
                       m_actual, needs_mask, tiles_per_core):
    n_layers = len(acts)
    o_ref = rest[2 * n_layers]   # per-core (tile_m, dp_target) f32 accumulator slab

    @pl.when(pl.program_id(1) == 0)            # first batch tile of this core
    def _init():
        o_ref[...] = jnp.zeros_like(o_ref)

    h = x_ref[...]                              # bf16 input tile
    inp = h                                     # MSE target when snapshot_at == 0
    for li in range(n_layers):
        if li == snapshot_at:
            inp = h                             # activation entering layer `index`
        w = rest[2 * li][...]                   # bf16, zero-padded, VMEM-resident
        b = rest[2 * li + 1][...]               # f32 (1, dpo)
        y = jnp.dot(h.astype(w.dtype), w, preferred_element_type=jnp.float32) + b
        if acts[li]:
            if slope == 0.0:
                y = jnp.maximum(y, 0.0)
            elif 0.0 < slope < 1.0:
                y = jnp.maximum(y, slope * y)   # mul+max instead of cmp+mul+select
            else:
                y = jnp.where(y >= 0.0, y, slope * y)
        h = y

    d = h - inp.astype(jnp.float32)             # padded cols are zero on both sides

    def _accum(dd):
        o_ref[...] += dd * dd                   # pure-VPU, lane-dense accumulation

    if needs_mask:
        gt = pl.program_id(0) * tiles_per_core + pl.program_id(1)   # global tile id
        tile_has_pad = (gt + 1) * tile_m > m_actual

        @pl.when(jnp.logical_not(tile_has_pad))
        def _():
            _accum(d)

        @pl.when(tile_has_pad)                  # only trailing tiles pay the mask
        def _():
            row = jax.lax.broadcasted_iota(jnp.int32, d.shape, 0) + gt * tile_m
            _accum(jnp.where(row < m_actual, d, 0.0))
    else:
        _accum(d)


# ---------------------------------------------------------------------------
# Parameters (pre-padded / pre-cast so per-forward cost is zero)
# ---------------------------------------------------------------------------
def init_sdae_params(dim, key, std=0.01):
    """enc[i]: (dim[i] -> dim[i+1]); dec[i]: (dim[i+1] -> dim[i]).  Bias = 0.
    Weights zero-padded to 128-lane multiples and stored bf16; biases f32."""
    nlayers = len(dim) - 1
    enc, dec = [], []
    keys = jax.random.split(key, 2 * nlayers)
    for i in range(nlayers):
        di, do = dim[i], dim[i + 1]
        dpi, dpo = _round_up(di, _LANE), _round_up(do, _LANE)
        w_e = std * jax.random.normal(keys[2 * i], (di, do), jnp.float32)
        w_e = jnp.pad(w_e, ((0, dpi - di), (0, dpo - do))).astype(jnp.bfloat16)
        b_e = jnp.zeros((1, dpo), jnp.float32)
        w_d = std * jax.random.normal(keys[2 * i + 1], (do, di), jnp.float32)
        w_d = jnp.pad(w_d, ((0, dpo - do), (0, dpi - di))).astype(jnp.bfloat16)
        b_d = jnp.zeros((1, dpi), jnp.float32)
        enc.append((w_e, b_e))
        dec.append((w_d, b_d))
    return enc, dec


# ---------------------------------------------------------------------------
# Static layer chain for one pretraining stage (matches SDAE.forward).
# ---------------------------------------------------------------------------
def _stage_chain(enc, dec, dims, index):
    nlayers = len(dims) - 1
    if index < nlayers:
        layers = [enc[i] for i in range(index)] + [enc[index], dec[index]]
        acts = tuple([True] * index + [index < nlayers - 1, index != 0])
        snapshot_at = index
        target_dim = dims[index]
    else:  # full autoencoder pass
        layers = ([enc[i] for i in range(nlayers)]
                  + [dec[i] for i in reversed(range(nlayers))])
        acts = tuple([i < nlayers - 1 for i in range(nlayers)]
                     + [i != 0 for i in reversed(range(nlayers))])
        snapshot_at = 0
        target_dim = dims[0]
    return layers, acts, snapshot_at, target_dim


# ---------------------------------------------------------------------------
# One-time input prep (hoisted out of the per-stage forward; x is reused
# across all pretraining stages).  bf16 halves the only per-tile HBM stream.
# ---------------------------------------------------------------------------
def prepare_input(x, dims):
    in_dim = dims[0]
    x2 = jnp.asarray(x).reshape(-1, in_dim)
    m = int(x2.shape[0])
    d0p = _round_up(in_dim, _LANE)
    m8 = _round_up(m, _SUBLANE)
    xp = jnp.pad(x2, ((0, m8 - m), (0, d0p - in_dim))).astype(jnp.bfloat16)
    return xp, m


def _vmem_budget_bytes():
    try:
        cap = int(pltpu.get_tpu_info().vmem_capacity_bytes)
    except Exception:
        cap = 64 << 20        # safe on every generation (v7x physical VMEM = 64 MiB)
    return max(cap - (16 << 20), 24 << 20)


def _resident_spec(shape, single_buffer):
    """Constant-index (VMEM-resident) block; single-buffered when supported so the
    resident weight set only occupies one buffer (critical on v7x's 64 MiB VMEM)."""
    index_map = lambda c, i: (0, 0)
    if single_buffer:
        try:
            return pl.BlockSpec(shape, index_map, pipeline_mode=pl.Buffered(1))
        except TypeError:     # BlockSpec without pipeline_mode support
            pass
    return pl.BlockSpec(shape, index_map)


# ---------------------------------------------------------------------------
# Forward: one fused pallas_call per pretraining stage
# ---------------------------------------------------------------------------
@functools.partial(jax.jit, static_argnames=("dims", "index", "m", "slope",
                                              "max_tile_m", "single_buffer"))
def sdae_forward(xp, enc, dec, *, dims, index, m, slope=0.0, max_tile_m=1024,
                 single_buffer=True):
    in_dim = dims[0]
    d0p = _round_up(in_dim, _LANE)
    assert xp.shape[1] == d0p, "xp must be column-padded by prepare_input()"
    xp = xp.astype(jnp.bfloat16)

    layers, acts, snapshot_at, target_dim = _stage_chain(enc, dec, dims, index)
    dpt = _round_up(target_dim, _LANE)       # padded width of the MSE operands

    # ---- per-generation VMEM budget -> batch tile size ----------------------
    weight_buffers = 1 if single_buffer else 2
    weight_bytes = sum(int(w.size) * w.dtype.itemsize + int(b.size) * b.dtype.itemsize
                       for w, b in layers) * weight_buffers
    max_dp = max([d0p] + [int(w.shape[1]) for w, _ in layers])
    # bytes/row: x (bf16, double-buffered) + output slab (f32, assume 2 buffers)
    # + live f32 activations / spill headroom.
    per_row = 4 * d0p + 8 * dpt + 24 * max_dp
    budget = _vmem_budget_bytes()
    avail = budget - weight_bytes - (4 << 20)
    cap_rows = (max(_SUBLANE, (avail // per_row) // _SUBLANE * _SUBLANE)
                if avail > 0 else _SUBLANE)

    m8 = _round_up(m, _SUBLANE)
    tile_m = min(m8, int(max_tile_m), int(cap_rows), 1024)
    tile_m = max(_SUBLANE, tile_m // _SUBLANE * _SUBLANE)

    # ---- grid: (core, batch-tile).  Leading "parallel" axis lets v7x put half
    # the batch tiles on each TensorCore (serial, harmless on 1-TC v5e/v6e). ---
    num_tiles = _cdiv(m8, tile_m)
    num_cores = 2 if num_tiles >= 2 else 1
    tiles_per_core = _cdiv(num_tiles, num_cores)
    num_tiles = tiles_per_core * num_cores
    m_padded = num_tiles * tile_m
    if m_padded > xp.shape[0]:
        xp = jnp.pad(xp, ((0, m_padded - xp.shape[0]), (0, 0)))
    needs_mask = m_padded > m

    vmem_limit = int(min(budget,
                         max(weight_bytes + per_row * tile_m + (8 << 20), 32 << 20)))

    # ---- specs --------------------------------------------------------------
    in_specs = [pl.BlockSpec((tile_m, d0p),
                             lambda c, i: (c * tiles_per_core + i, 0))]
    flat_params = []
    for w, b in layers:
        flat_params += [w, b]
        in_specs.append(_resident_spec(w.shape, single_buffer))
        in_specs.append(_resident_spec(b.shape, single_buffer))

    kernel = functools.partial(
        _sdae_fused_kernel, acts=acts, snapshot_at=snapshot_at, slope=slope,
        tile_m=tile_m, m_actual=m, needs_mask=needs_mask,
        tiles_per_core=tiles_per_core)

    sq = pl.pallas_call(
        kernel,
        grid=(num_cores, tiles_per_core),
        in_specs=in_specs,
        out_specs=pl.BlockSpec((tile_m, dpt), lambda c, i: (c, 0)),
        out_shape=jax.ShapeDtypeStruct((num_cores * tile_m, dpt), jnp.float32),
        compiler_params=pltpu.CompilerParams(
            dimension_semantics=("parallel", "arbitrary"),
            vmem_limit_bytes=vmem_limit),
    )(xp, *flat_params)

    # Tiny final reduce + mean in XLA (tree-summed f32, lane-dense kernel stores).
    return jnp.sum(sq) / (m * target_dim)


def sdae_loss(xp, m, enc, dec, *, dims, index, slope=0.0, max_tile_m=1024):
    """Robust entry point: falls back to default double-buffered weights if the
    installed JAX rejects single-buffered (Buffered(1)) resident blocks."""
    global _SINGLE_BUFFER_WEIGHTS
    if _SINGLE_BUFFER_WEIGHTS:
        try:
            return sdae_forward(xp, enc, dec, dims=dims, index=index, m=m,
                                slope=slope, max_tile_m=max_tile_m,
                                single_buffer=True)
        except Exception:
            _SINGLE_BUFFER_WEIGHTS = False
    return sdae_forward(xp, enc, dec, dims=dims, index=index, m=m,
                        slope=slope, max_tile_m=max_tile_m, single_buffer=False)


# ---------------------------------------------------------------------------
# Pure-JAX reference of the same mixed-precision math (for validation)
# ---------------------------------------------------------------------------
def sdae_forward_ref(xp, m, enc, dec, dims, index, slope=0.0):
    layers, acts, snapshot_at, target_dim = _stage_chain(enc, dec, dims, index)
    h = xp[:m]
    inp = h
    for li, (w, b) in enumerate(layers):
        if li == snapshot_at:
            inp = h
        y = jnp.dot(h.astype(w.dtype), w, preferred_element_type=jnp.float32) + b
        if acts[li]:
            y = jnp.maximum(y, 0.0) if slope == 0.0 else jnp.where(y >= 0.0, y, slope * y)
        h = y
    d = h - inp.astype(jnp.float32)
    return jnp.sum(d * d) / (m * target_dim)


# ---------------------------------------------------------------------------
if __name__ == "__main__":
    dim = (64, 32, 16)       # nlayers = 2
    slope = 0.0              # SDAE default (leaky_relu -> relu)
    nlayers = len(dim) - 1

    key = jax.random.PRNGKey(0)
    pkey, k1, k2 = jax.random.split(key, 3)
    enc, dec = init_sdae_params(dim, pkey)

    cases = [
        # (x, max_tile_m): a small single-tile case, and a multi-tile case that
        # exercises the 2-D (core, tile) grid, the resident accumulator across
        # tiles and the padded-batch-row mask.
        (jax.random.normal(k1, (8, 64), jnp.float32), 1024),
        (jax.random.normal(k2, (200, 64), jnp.float32), 64),
    ]

    for x, max_tile_m in cases:
        xp, m = prepare_input(x, dim)
        for index in (0, 1, nlayers):   # layer-wise pretrain stages + full AE pass
            loss = jax.block_until_ready(
                sdae_loss(xp, m, enc, dec, dims=dim, index=index,
                          slope=slope, max_tile_m=max_tile_m))
            ref = float(jax.block_until_ready(
                sdae_forward_ref(xp, m, enc, dec, dim, index, slope)))
            val = float(loss)
            assert jnp.isfinite(val), f"non-finite loss at index={index}"
            assert abs(val - ref) <= 5e-2 * abs(ref) + 1e-5, (
                f"mismatch at index={index}: pallas={val} ref={ref}")

    print("KERNEL_OK")
</pallas_src>

<mosaic_0001>
module attributes {stable_mosaic.version = 11 : i64} {
  func.func @_sdae_fused_kernel(%arg0: i32, %arg1: i32, %arg2: memref<8x128xbf16, #tpu.memory_space<vmem>>, %arg3: memref<128x128xbf16, #tpu.memory_space<vmem>>, %arg4: memref<1x128xf32, #tpu.memory_space<vmem>>, %arg5: memref<128x128xbf16, #tpu.memory_space<vmem>>, %arg6: memref<1x128xf32, #tpu.memory_space<vmem>>, %arg7: memref<8x128xf32, #tpu.memory_space<vmem>>) attributes {dimension_semantics = [#tpu.dimension_semantics<parallel>, #tpu.dimension_semantics<arbitrary>], iteration_bounds = array<i64: 1, 1>, scalar_prefetch = 0 : i64, scratch_operands = 0 : i64, tpu.core_type = #tpu.core_type<tc>, window_params = [{transform_indices = @transform_0, window_bounds = array<i64: 8, 128>}, {pipeline_mode = #tpu.pipeline_mode<synchronous>, transform_indices = @transform_1, window_bounds = array<i64: 128, 128>}, {pipeline_mode = #tpu.pipeline_mode<synchronous>, transform_indices = @transform_2, window_bounds = array<i64: 1, 128>}, {pipeline_mode = #tpu.pipeline_mode<synchronous>, transform_indices = @transform_3, window_bounds = array<i64: 128, 128>}, {pipeline_mode = #tpu.pipeline_mode<synchronous>, transform_indices = @transform_4, window_bounds = array<i64: 1, 128>}, {transform_indices = @transform_5, window_bounds = array<i64: 8, 128>}]} {
    %c0_i32 = arith.constant 0 : i32
    %0 = arith.cmpi eq, %arg1, %c0_i32 : i32
    %1 = arith.extui %0 : i1 to i32
    %c0_i32_0 = arith.constant 0 : i32
    %2 = arith.cmpi ne, %1, %c0_i32_0 : i32
    scf.if %2 {
      %cst_16 = arith.constant 0.000000e+00 : f32
      %23 = vector.broadcast %cst_16 : f32 to vector<8x128xf32>
      %c0_17 = arith.constant 0 : index
      %c0_18 = arith.constant 0 : index
      %24 = vector.load %arg7[%c0_17, %c0_18] : memref<8x128xf32, #tpu.memory_space<vmem>>, vector<8x128xf32>
      tpu.vector_store %arg7[%c0_17, %c0_18], %23 {strides = array<i32>} : memref<8x128xf32, #tpu.memory_space<vmem>>, vector<8x128xf32>,
    } else {
    }
    %c0 = arith.constant 0 : index
    %c0_1 = arith.constant 0 : index
    %3 = vector.load %arg2[%c0, %c0_1] : memref<8x128xbf16, #tpu.memory_space<vmem>>, vector<8x128xbf16>
    %c0_2 = arith.constant 0 : index
    %c0_3 = arith.constant 0 : index
    %4 = vector.load %arg3[%c0_2, %c0_3] : memref<128x128xbf16, #tpu.memory_space<vmem>>, vector<128x128xbf16>
    %c0_4 = arith.constant 0 : index
    %c0_5 = arith.constant 0 : index
    %5 = vector.load %arg4[%c0_4, %c0_5] : memref<1x128xf32, #tpu.memory_space<vmem>>, vector<1x128xf32>
    %cst = arith.constant dense<0.000000e+00> : vector<8x128xf32>
    %6 = tpu.matmul %3, %4, %cst {dimension_numbers = #tpu.dot_dimension_numbers<[1], [0], [0], [1], [0, 0, 1, 1], [], []>} : vector<8x128xbf16>, vector<128x128xbf16>, vector<8x128xf32> -> vector<8x128xf32>
    %7 = vector.broadcast %5 : vector<1x128xf32> to vector<8x128xf32>
    %8 = arith.addf %6, %7 : vector<8x128xf32>
    %cst_6 = arith.constant 0.000000e+00 : f32
    %9 = vector.broadcast %cst_6 : f32 to vector<8x128xf32>
    %10 = arith.maximumf %8, %9 : vector<8x128xf32>
    %c0_7 = arith.constant 0 : index
    %c0_8 = arith.constant 0 : index
    %11 = vector.load %arg5[%c0_7, %c0_8] : memref<128x128xbf16, #tpu.memory_space<vmem>>, vector<128x128xbf16>
    %c0_9 = arith.constant 0 : index
    %c0_10 = arith.constant 0 : index
    %12 = vector.load %arg6[%c0_9, %c0_10] : memref<1x128xf32, #tpu.memory_space<vmem>>, vector<1x128xf32>
    %13 = arith.truncf %10 : vector<8x128xf32> to vector<8x128xbf16>
    %cst_11 = arith.constant dense<0.000000e+00> : vector<8x128xf32>
    %14 = tpu.matmul %13, %11, %cst_11 {dimension_numbers = #tpu.dot_dimension_numbers<[1], [0], [0], [1], [0, 0, 1, 1], [], []>} : vector<8x128xbf16>, vector<128x128xbf16>, vector<8x128xf32> -> vector<8x128xf32>
    %15 = vector.broadcast %12 : vector<1x128xf32> to vector<8x128xf32>
    %16 = arith.addf %14, %15 : vector<8x128xf32>
    %17 = arith.extf %3 : vector<8x128xbf16> to vector<8x128xf32>
    %18 = arith.subf %16, %17 : vector<8x128xf32>
    %c0_12 = arith.constant 0 : index
    %c0_13 = arith.constant 0 : index
    %19 = vector.load %arg7[%c0_12, %c0_13] : memref<8x128xf32, #tpu.memory_space<vmem>>, vector<8x128xf32>
    %20 = arith.mulf %18, %18 : vector<8x128xf32>
    %21 = arith.addf %19, %20 : vector<8x128xf32>
    %c0_14 = arith.constant 0 : index
    %c0_15 = arith.constant 0 : index
    %22 = vector.load %arg7[%c0_14, %c0_15] : memref<8x128xf32, #tpu.memory_space<vmem>>, vector<8x128xf32>
    tpu.vector_store %arg7[%c0_14, %c0_15], %21 {strides = array<i32>} : memref<8x128xf32, #tpu.memory_space<vmem>>, vector<8x128xf32>,
    return
  }
  func.func @transform_0(%arg0: i32, %arg1: i32) -> (i32, i32) {
    %c1_i32 = arith.constant 1 : i32
    %0 = arith.muli %arg0, %c1_i32 : i32
    %1 = arith.addi %0, %arg1 : i32
    %c0_i32 = arith.constant 0 : i32
    %c0_i32_0 = arith.constant 0 : i32
    return %1, %c0_i32 : i32, i32
  }
  func.func @transform_1(%arg0: i32, %arg1: i32) -> (i32, i32) {
    %c0_i32 = arith.constant 0 : i32
    %c0_i32_0 = arith.constant 0 : i32
    %c0_i32_1 = arith.constant 0 : i32
    return %c0_i32, %c0_i32_0 : i32, i32
  }
  func.func @transform_2(%arg0: i32, %arg1: i32) -> (i32, i32) {
    %c0_i32 = arith.constant 0 : i32
    %c0_i32_0 = arith.constant 0 : i32
    %c0_i32_1 = arith.constant 0 : i32
    return %c0_i32, %c0_i32_0 : i32, i32
  }
  func.func @transform_3(%arg0: i32, %arg1: i32) -> (i32, i32) {
    %c0_i32 = arith.constant 0 : i32
    %c0_i32_0 = arith.constant 0 : i32
    %c0_i32_1 = arith.constant 0 : i32
    return %c0_i32, %c0_i32_0 : i32, i32
  }
  func.func @transform_4(%arg0: i32, %arg1: i32) -> (i32, i32) {
    %c0_i32 = arith.constant 0 : i32
    %c0_i32_0 = arith.constant 0 : i32
    %c0_i32_1 = arith.constant 0 : i32
    return %c0_i32, %c0_i32_0 : i32, i32
  }
  func.func @transform_5(%arg0: i32, %arg1: i32) -> (i32, i32) {
    %c0_i32 = arith.constant 0 : i32
    %c0_i32_0 = arith.constant 0 : i32
    return %arg0, %c0_i32 : i32, i32
  }
}

module attributes {stable_mosaic.version = 11 : i64} {
  func.func @_sdae_fused_kernel(%arg0: i32, %arg1: i32, %arg2: memref<8x128xbf16, #tpu.memory_space<vmem>>, %arg3: memref<128x128xbf16, #tpu.memory_space<vmem>>, %arg4: memref<1x128xf32, #tpu.memory_space<vmem>>, %arg5: memref<128x128xbf16, #tpu.memory_space<vmem>>, %arg6: memref<1x128xf32, #tpu.memory_space<vmem>>, %arg7: memref<8x128xf32, #tpu.memory_space<vmem>>) attributes {dimension_semantics = [#tpu.dimension_semantics<parallel>, #tpu.dimension_semantics<arbitrary>], iteration_bounds = array<i64: 1, 1>, scalar_prefetch = 0 : i64, scratch_operands = 0 : i64, tpu.core_type = #tpu.core_type<tc>, window_params = [{transform_indices = @transform_0, window_bounds = array<i64: 8, 128>}, {pipeline_mode = #tpu.pipeline_mode<synchronous>, transform_indices = @transform_1, window_bounds = array<i64: 128, 128>}, {pipeline_mode = #tpu.pipeline_mode<synchronous>, transform_indices = @transform_2, window_bounds = array<i64: 1, 128>}, {pipeline_mode = #tpu.pipeline_mode<synchronous>, transform_indices = @transform_3, window_bounds = array<i64: 128, 128>}, {pipeline_mode = #tpu.pipeline_mode<synchronous>, transform_indices = @transform_4, window_bounds = array<i64: 1, 128>}, {transform_indices = @transform_5, window_bounds = array<i64: 8, 128>}]} {
    %c0_i32 = arith.constant 0 : i32
    %0 = arith.cmpi eq, %arg1, %c0_i32 : i32
    %1 = arith.extui %0 : i1 to i32
    %c0_i32_0 = arith.constant 0 : i32
    %2 = arith.cmpi ne, %1, %c0_i32_0 : i32
    scf.if %2 {
      %cst_16 = arith.constant 0.000000e+00 : f32
      %23 = vector.broadcast %cst_16 : f32 to vector<8x128xf32>
      %c0_17 = arith.constant 0 : index
      %c0_18 = arith.constant 0 : index
      %24 = vector.load %arg7[%c0_17, %c0_18] : memref<8x128xf32, #tpu.memory_space<vmem>>, vector<8x128xf32>
      tpu.vector_store %arg7[%c0_17, %c0_18], %23 {strides = array<i32>} : memref<8x128xf32, #tpu.memory_space<vmem>>, vector<8x128xf32>,
    } else {
    }
    %c0 = arith.constant 0 : index
    %c0_1 = arith.constant 0 : index
    %3 = vector.load %arg2[%c0, %c0_1] : memref<8x128xbf16, #tpu.memory_space<vmem>>, vector<8x128xbf16>
    %c0_2 = arith.constant 0 : index
    %c0_3 = arith.constant 0 : index
    %4 = vector.load %arg3[%c0_2, %c0_3] : memref<128x128xbf16, #tpu.memory_space<vmem>>, vector<128x128xbf16>
    %c0_4 = arith.constant 0 : index
    %c0_5 = arith.constant 0 : index
    %5 = vector.load %arg4[%c0_4, %c0_5] : memref<1x128xf32, #tpu.memory_space<vmem>>, vector<1x128xf32>
    %cst = arith.constant dense<0.000000e+00> : vector<8x128xf32>
    %6 = tpu.matmul %3, %4, %cst {dimension_numbers = #tpu.dot_dimension_numbers<[1], [0], [0], [1], [0, 0, 1, 1], [], []>} : vector<8x128xbf16>, vector<128x128xbf16>, vector<8x128xf32> -> vector<8x128xf32>
    %7 = vector.broadcast %5 : vector<1x128xf32> to vector<8x128xf32>
    %8 = arith.addf %6, %7 : vector<8x128xf32>
    %cst_6 = arith.constant 0.000000e+00 : f32
    %9 = vector.broadcast %cst_6 : f32 to vector<8x128xf32>
    %10 = arith.maximumf %8, %9 : vector<8x128xf32>
    %c0_7 = arith.constant 0 : index
    %c0_8 = arith.constant 0 : index
    %11 = vector.load %arg5[%c0_7, %c0_8] : memref<128x128xbf16, #tpu.memory_space<vmem>>, vector<128x128xbf16>
    %c0_9 = arith.constant 0 : index
    %c0_10 = arith.constant 0 : index
    %12 = vector.load %arg6[%c0_9, %c0_10] : memref<1x128xf32, #tpu.memory_space<vmem>>, vector<1x128xf32>
    %13 = arith.truncf %10 : vector<8x128xf32> to vector<8x128xbf16>
    %cst_11 = arith.constant dense<0.000000e+00> : vector<8x128xf32>
    %14 = tpu.matmul %13, %11, %cst_11 {dimension_numbers = #tpu.dot_dimension_numbers<[1], [0], [0], [1], [0, 0, 1, 1], [], []>} : vector<8x128xbf16>, vector<128x128xbf16>, vector<8x128xf32> -> vector<8x128xf32>
    %15 = vector.broadcast %12 : vector<1x128xf32> to vector<8x128xf32>
    %16 = arith.addf %14, %15 : vector<8x128xf32>
    %17 = arith.extf %3 : vector<8x128xbf16> to vector<8x128xf32>
    %18 = arith.subf %16, %17 : vector<8x128xf32>
    %c0_12 = arith.constant 0 : index
    %c0_13 = arith.constant 0 : index
    %19 = vector.load %arg7[%c0_12, %c0_13] : memref<8x128xf32, #tpu.memory_space<vmem>>, vector<8x128xf32>
    %20 = arith.mulf %18, %18 : vector<8x128xf32>
    %21 = arith.addf %19, %20 : vector<8x128xf32>
    %c0_14 = arith.constant 0 : index
    %c0_15 = arith.constant 0 : index
    %22 = vector.load %arg7[%c0_14, %c0_15] : memref<8x128xf32, #tpu.memory_space<vmem>>, vector<8x128xf32>
    tpu.vector_store %arg7[%c0_14, %c0_15], %21 {strides = array<i32>} : memref<8x128xf32, #tpu.memory_space<vmem>>, vector<8x128xf32>,
    return
  }
  func.func @transform_0(%arg0: i32, %arg1: i32) -> (i32, i32) {
    %c1_i32 = arith.constant 1 : i32
    %0 = arith.muli %arg0, %c1_i32 : i32
    %1 = arith.addi %0, %arg1 : i32
    %c0_i32 = arith.constant 0 : i32
    %c0_i32_0 = arith.constant 0 : i32
    return %1, %c0_i32 : i32, i32
  }
  func.func @transform_1(%arg0: i32, %arg1: i32) -> (i32, i32) {
    %c0_i32 = arith.constant 0 : i32
    %c0_i32_0 = arith.constant 0 : i32
    %c0_i32_1 = arith.constant 0 : i32
    return %c0_i32, %c0_i32_0 : i32, i32
  }
  func.func @transform_2(%arg0: i32, %arg1: i32) -> (i32, i32) {
    %c0_i32 = arith.constant 0 : i32
    %c0_i32_0 = arith.constant 0 : i32
    %c0_i32_1 = arith.constant 0 : i32
    return %c0_i32, %c0_i32_0 : i32, i32
  }
  func.func @transform_3(%arg0: i32, %arg1: i32) -> (i32, i32) {
    %c0_i32 = arith.constant 0 : i32
    %c0_i32_0 = arith.constant 0 : i32
    %c0_i32_1 = arith.constant 0 : i32
    return %c0_i32, %c0_i32_0 : i32, i32
  }
  func.func @transform_4(%arg0: i32, %arg1: i32) -> (i32, i32) {
    %c0_i32 = arith.constant 0 : i32
    %c0_i32_0 = arith.constant 0 : i32
    %c0_i32_1 = arith.constant 0 : i32
    return %c0_i32, %c0_i32_0 : i32, i32
  }
  func.func @transform_5(%arg0: i32, %arg1: i32) -> (i32, i32) {
    %c0_i32 = arith.constant 0 : i32
    %c0_i32_0 = arith.constant 0 : i32
    return %arg0, %c0_i32 : i32, i32
  }
}

</mosaic_0001>

<bundles_post_ra>
// kernel: sdae_forward.1
= control target key start
LH: loop header
LB: loop body
LE: loop exit
PB: predicated region body
PF: predicated region fallthrough
CT: control target
= control target key end

     0   :  { %10 = vsyncpa [#allocation3], 0  ;;  %s563_s0 = inlined_call_operand.hbm [shape: bf16[8,128], index: 0, kind: input, shape index: {}]   ;;  %s564_s1 = inlined_call_operand.hbm [shape: bf16[128,128], index: 1, kind: input, shape index: {}]   ;;  %s565_s2 = inlined_call_operand.vmem [shape: f32[1,128], index: 2, kind: input, shape index: {}]   ;;  %s566_s3 = inlined_call_operand.hbm [shape: bf16[128,128], index: 3, kind: input, shape index: {}]   ;;  %s567_s4 = inlined_call_operand.vmem [shape: f32[1,128], index: 4, kind: input, shape index: {}]   ;;  %s568_s5 = inlined_call_operand.vmem [shape: f32[8,128], index: 5, kind: output, shape index: {}]  }
   0x1   :  { %11 = vsyncpa [#allocation5], 0  ;;  %s475_s18 = smov [#allocation4]   ;;  %s405_s22 = scalar_lea.hbm %s564_s1, 1024 }
   0x2   :  { %s30_s19 = sshll.u32 %s475_s18, 4  ;;  %p406_p0 = scmp.ne.s32.totalorder %s564_s1, %s405_s22  ;;  %s31_s19 = int_to_ptr.vmem [resolvable:$true] %s30_s19 }
   0x3   :  { %p409_p1 = scmp.lt.u32.totalorder %s405_s22, %s564_s1 }
   0x5   :  { %p411_p2 = pnand %p409_p1, %p406_p0 }
   0x7   :  { %414 = shalt.err (!%p411_p2)
}
   0x8   :  { %s415_s27 = scalar_lea.vmem %s31_s19, 1024  ;;  %p420_p4 = scmp.lt.s32.totalorder %s31_s19, %s31_s19 }
   0x9   :  { %p416_p3 = scmp.ne.s32.totalorder %s31_s19, %s415_s27  ;;  %p421_p5 = scmp.lt.s32.totalorder %s415_s27, %s415_s27 }
   0xb   :  { %p422_p6 = por %p421_p5, %p420_p4 }
   0xd   :  { %p423_p7 = pnand %p422_p6, %p416_p3 }
   0xf   :  { %426 = shalt.err (!%p423_p7)
}
  0x10   :  { %s476_s28 = smov 64   ;;  %s477_s29 = smov 4  }
  0x11   :  { %36 = dma.hbm_to_vmem [thread:$0]  %s564_s1, 1024, %s31_s19, [#allocation5], %s476_s28, %s476_s28, %s477_s29  }
  0x12   :  { %s478_s7 = smov [#allocation2]   ;;  %s479_s9 = smov [#allocation6]  }
  0x13   :  { %s21_s8 = sshll.u32 %s478_s7, 4  ;;  %s44_s10 = sshll.u32 %s479_s9, 4  ;;  %s22_s8 = int_to_ptr.vmem [resolvable:$true] %s21_s8  ;;  %s45_s10 = int_to_ptr.vmem [resolvable:$true] %s44_s10 }
  0x14   :  { %s427_s13 = scalar_lea.hbm %s563_s0, 64 }
  0x15   :  { %p428_p8 = scmp.ne.s32.totalorder %s563_s0, %s427_s13  ;;  %p431_p9 = scmp.lt.u32.totalorder %s427_s13, %s563_s0 }
  0x17   :  { %p433_p10 = pnand %p431_p9, %p428_p8 }
  0x19   :  { %436 = shalt.err (!%p433_p10)
}
  0x1a   :  { %s437_s1 = scalar_lea.vmem %s22_s8, 64  ;;  %p442_p12 = scmp.lt.s32.totalorder %s22_s8, %s22_s8 }
  0x1b   :  { %p438_p11 = scmp.ne.s32.totalorder %s22_s8, %s437_s1  ;;  %p443_p13 = scmp.lt.s32.totalorder %s437_s1, %s437_s1 }
  0x1d   :  { %p444_p0 = por %p443_p13, %p442_p12 }
  0x1f   :  { %p445_p1 = pnand %p444_p0, %p438_p11 }
  0x21   :  { %448 = shalt.err (!%p445_p1)
}
  0x22   :  { %24 = dma.hbm_to_vmem [thread:$0]  %s563_s0, 64, %s22_s8, [#allocation3]  }
  0x23   :  { %s449_s22 = scalar_lea.hbm %s566_s3, 1024 }
  0x24   :  { %p450_p2 = scmp.ne.s32.totalorder %s566_s3, %s449_s22  ;;  %p453_p3 = scmp.lt.u32.totalorder %s449_s22, %s566_s3 }
  0x26   :  { %p455_p4 = pnand %p453_p3, %p450_p2 }
  0x28   :  { %458 = shalt.err (!%p455_p4)
}
  0x29   :  { %s459_s27 = scalar_lea.vmem %s45_s10, 1024  ;;  %p464_p6 = scmp.lt.s32.totalorder %s45_s10, %s45_s10 }
  0x2a   :  { %p460_p5 = scmp.ne.s32.totalorder %s45_s10, %s459_s27  ;;  %p465_p7 = scmp.lt.s32.totalorder %s459_s27, %s459_s27 }
  0x2c   :  { %p466_p8 = por %p465_p7, %p464_p6 }
  0x2e   :  { %p467_p9 = pnand %p466_p8, %p460_p5 }
  0x30   :  { %470 = shalt.err (!%p467_p9)
}
  0x31   :  { %50 = dma.hbm_to_vmem [thread:$0]  %s566_s3, 1024, %s45_s10, [#allocation5], %s476_s28, %s476_s28, %s477_s29  }
  0x32   :  { %471 = dma.done.wait [#allocation3], 64  }
  0x33   :  { %472 = vsyncadd [#allocation3], 4294967232 }
  0x34   :  { %473 = dma.done.wait [#allocation5], 2048  }
  0x35   :  { %474 = vsyncadd [#allocation5], 4294965248  ;;  %v480_v0 = vmov 0.0   ;;  %vm481_vm0 = vmmov 0   ;;  %v389_v1 = vld [vmem:[#allocation4] sm:$0xff]   ;;  %v390_v2 = vld [vmem:[#allocation4 + $0x8] sm:$0xff]  }
  0x36   :  { %342 = vmatprep.subr.bf16.mxu0 %v480_v0  ;;  %358 = vmatprep.mubr.msk.bf16.mxu0 %vm481_vm0, %v480_v0  ;;  %v391_v3 = vld [vmem:[#allocation4 + $0x10] sm:$0xff]   ;;  %v397_v4 = vld [vmem:[#allocation6] sm:$0xff]   ;;  %v392_v5 = vld [vmem:[#allocation4 + $0x18] sm:$0xff]  }
  0x37   :  { %362 = vmatprep.subr.bf16.mxu1 %v480_v0  ;;  %378 = vmatprep.mubr.msk.bf16.mxu1 %vm481_vm0, %v480_v0  ;;  %v398_v6 = vld [vmem:[#allocation6 + $0x8] sm:$0xff]   ;;  %v393_v7 = vld [vmem:[#allocation4 + $0x20] sm:$0xff]   ;;  %v399_v8 = vld [vmem:[#allocation6 + $0x10] sm:$0xff]  }
  0x38   :  { %343 = vmatpush3.bf16.msra.mxu0 %v389_v1  ;;  %363 = vmatpush3.bf16.msra.mxu1 %v397_v4  ;;  %v394_v9 = vld [vmem:[#allocation4 + $0x28] sm:$0xff]   ;;  %v400_v10 = vld [vmem:[#allocation6 + $0x18] sm:$0xff]   ;;  %v395_v11 = vld [vmem:[#allocation4 + $0x30] sm:$0xff]  }
  0x39   :  { %344 = vmatprep.subr.bf16.mxu0 %v480_v0  ;;  %364 = vmatprep.subr.bf16.mxu1 %v480_v0  ;;  %v401_v12 = vld [vmem:[#allocation6 + $0x20] sm:$0xff]   ;;  %v396_v13 = vld [vmem:[#allocation4 + $0x38] sm:$0xff]   ;;  %v402_v14 = vld [vmem:[#allocation6 + $0x28] sm:$0xff]  }
  0x3a   :  { %v69_v15 = vld [vmem:[#allocation2] sm:$0xf]  ;;  %v403_v16 = vld [vmem:[#allocation6 + $0x30] sm:$0xff]  }
  0x3b   :  { %v404_v17 = vld [vmem:[#allocation6 + $0x38] sm:$0xff]   ;;  %v294_v27 = vunpack.c.l.bf16 %v69_v15 }
  0x3c   :  { %345 = vmatpush3.bf16.msra.mxu0 %v390_v2  ;;  %365 = vmatpush3.bf16.msra.mxu1 %v398_v6  ;;  %v306_v18 = vld [vmem:[%s565_s2] ss:$0 sm:$0xff] }
  0x3d   :  { %346 = vmatprep.subr.bf16.mxu0 %v480_v0  ;;  %366 = vmatprep.subr.bf16.mxu1 %v480_v0  ;;  %v315_v26 = vld [vmem:[%s567_s4] ss:$0 sm:$0xff] }
  0x40   :  { %347 = vmatpush3.bf16.msra.mxu0 %v391_v3  ;;  %367 = vmatpush3.bf16.msra.mxu1 %v399_v8 }
  0x41   :  { %348 = vmatprep.subr.bf16.mxu0 %v480_v0  ;;  %368 = vmatprep.subr.bf16.mxu1 %v480_v0 }
  0x44   :  { %349 = vmatpush3.bf16.msra.mxu0 %v392_v5  ;;  %369 = vmatpush3.bf16.msra.mxu1 %v400_v10 }
  0x45   :  { %350 = vmatprep.subr.bf16.mxu0 %v480_v0  ;;  %370 = vmatprep.subr.bf16.mxu1 %v480_v0 }
  0x48   :  { %351 = vmatpush3.bf16.msra.mxu0 %v393_v7  ;;  %371 = vmatpush3.bf16.msra.mxu1 %v401_v12 }
  0x49   :  { %352 = vmatprep.subr.bf16.mxu0 %v480_v0  ;;  %372 = vmatprep.subr.bf16.mxu1 %v480_v0 }
  0x4c   :  { %353 = vmatpush3.bf16.msra.mxu0 %v394_v9  ;;  %373 = vmatpush3.bf16.msra.mxu1 %v402_v14 }
  0x4d   :  { %354 = vmatprep.subr.bf16.mxu0 %v480_v0  ;;  %374 = vmatprep.subr.bf16.mxu1 %v480_v0 }
  0x50   :  { %355 = vmatpush3.bf16.msra.mxu0 %v395_v11  ;;  %375 = vmatpush3.bf16.msra.mxu1 %v403_v16 }
  0x51   :  { %356 = vmatprep.subr.bf16.mxu0 %v480_v0  ;;  %376 = vmatprep.subr.bf16.mxu1 %v480_v0 }
  0x54   :  { %357 = vmatpush3.bf16.msra.mxu0 %v396_v13  ;;  %377 = vmatpush3.bf16.msra.mxu1 %v404_v17 }
  0x57   :  { %359 = vmatmul.mubr.bf16.vlgmr.msra.gmra.mrb[0].mxu0 %v69_v15 }
 0x12a   :  { %v175_v19 = vpop.f32.mrb[0].mxu0 }
 0x12b   :  { %v176_v20 = vadd.f32 %v306_v18, %v175_v19  ;;  %v360_v21 = vpop.f32.mrb[1].mxu0 }
 0x12c   :  { %v178_v22 = vpop.f32.mrb[2].mxu0 }
 0x12d   :  { %v181_v23 = vmax.f32 %v176_v20, 0.0  ;;  %v361_v24 = vpop.f32.mrb[3].mxu0 }
 0x12f   :  { %v199_v25 = vpack.c.bf16 %v181_v23, %v181_v23 }
 0x131   :  { %379 = vmatmul.mubr.bf16.vlgmr.msra.gmra.mrb[0].mxu1 %v199_v25 }
 0x204   :  { %v288_v28 = vpop.f32.mrb[0].mxu1 }
 0x205   :  { %v289_v29 = vadd.f32 %v315_v26, %v288_v28  ;;  %v380_v30 = vpop.f32.mrb[1].mxu1 }
 0x206   :  { %v291_v31 = vpop.f32.mrb[2].mxu1 }
 0x207   :  { %v295_v32 = vsub.f32 %v289_v29, %v294_v27  ;;  %v381_v33 = vpop.f32.mrb[3].mxu1 }
 0x209   :  { %v297_v34 = vmul.f32 %v295_v32, %v295_v32 }
 0x20b   :  { %299 = vst [vmem:[%s568_s5] sm:$0xff] %v297_v34 }
 0x20c   :  { %304 = vsyncpa [#allocation3], 1 }
 0x20d   :  { %305 = vsyncpa [#allocation5], 1 }

// kernel: sdae_forward.1
= control target key start
LH: loop header
LB: loop body
LE: loop exit
PB: predicated region body
PF: predicated region fallthrough
CT: control target
= control target key end

     0   :  { %10 = vsyncpa [#allocation3], 0  ;;  %s563_s0 = inlined_call_operand.hbm [shape: bf16[8,128], index: 0, kind: input, shape index: {}]   ;;  %s564_s1 = inlined_call_operand.hbm [shape: bf16[128,128], index: 1, kind: input, shape index: {}]   ;;  %s565_s2 = inlined_call_operand.vmem [shape: f32[1,128], index: 2, kind: input, shape index: {}]   ;;  %s566_s3 = inlined_call_operand.hbm [shape: bf16[128,128], index: 3, kind: input, shape index: {}]   ;;  %s567_s4 = inlined_call_operand.vmem [shape: f32[1,128], index: 4, kind: input, shape index: {}]   ;;  %s568_s5 = inlined_call_operand.vmem [shape: f32[8,128], index: 5, kind: output, shape index: {}]  }
   0x1   :  { %11 = vsyncpa [#allocation5], 0  ;;  %s475_s18 = smov [#allocation4]   ;;  %s405_s22 = scalar_lea.hbm %s564_s1, 1024 }
   0x2   :  { %s30_s19 = sshll.u32 %s475_s18, 4  ;;  %p406_p0 = scmp.ne.s32.totalorder %s564_s1, %s405_s22  ;;  %s31_s19 = int_to_ptr.vmem [resolvable:$true] %s30_s19 }
   0x3   :  { %p409_p1 = scmp.lt.u32.totalorder %s405_s22, %s564_s1 }
   0x5   :  { %p411_p2 = pnand %p409_p1, %p406_p0 }
   0x7   :  { %414 = shalt.err (!%p411_p2)
}
   0x8   :  { %s415_s27 = scalar_lea.vmem %s31_s19, 1024  ;;  %p420_p4 = scmp.lt.s32.totalorder %s31_s19, %s31_s19 }
   0x9   :  { %p416_p3 = scmp.ne.s32.totalorder %s31_s19, %s415_s27  ;;  %p421_p5 = scmp.lt.s32.totalorder %s415_s27, %s415_s27 }
   0xb   :  { %p422_p6 = por %p421_p5, %p420_p4 }
   0xd   :  { %p423_p7 = pnand %p422_p6, %p416_p3 }
   0xf   :  { %426 = shalt.err (!%p423_p7)
}
  0x10   :  { %s476_s28 = smov 64   ;;  %s477_s29 = smov 4  }
  0x11   :  { %36 = dma.hbm_to_vmem [thread:$0]  %s564_s1, 1024, %s31_s19, [#allocation5], %s476_s28, %s476_s28, %s477_s29  }
  0x12   :  { %s478_s7 = smov [#allocation2]   ;;  %s479_s9 = smov [#allocation6]  }
  0x13   :  { %s21_s8 = sshll.u32 %s478_s7, 4  ;;  %s44_s10 = sshll.u32 %s479_s9, 4  ;;  %s22_s8 = int_to_ptr.vmem [resolvable:$true] %s21_s8  ;;  %s45_s10 = int_to_ptr.vmem [resolvable:$true] %s44_s10 }
  0x14   :  { %s427_s13 = scalar_lea.hbm %s563_s0, 64 }
  0x15   :  { %p428_p8 = scmp.ne.s32.totalorder %s563_s0, %s427_s13  ;;  %p431_p9 = scmp.lt.u32.totalorder %s427_s13, %s563_s0 }
  0x17   :  { %p433_p10 = pnand %p431_p9, %p428_p8 }
  0x19   :  { %436 = shalt.err (!%p433_p10)
}
  0x1a   :  { %s437_s1 = scalar_lea.vmem %s22_s8, 64  ;;  %p442_p12 = scmp.lt.s32.totalorder %s22_s8, %s22_s8 }
  0x1b   :  { %p438_p11 = scmp.ne.s32.totalorder %s22_s8, %s437_s1  ;;  %p443_p13 = scmp.lt.s32.totalorder %s437_s1, %s437_s1 }
  0x1d   :  { %p444_p0 = por %p443_p13, %p442_p12 }
  0x1f   :  { %p445_p1 = pnand %p444_p0, %p438_p11 }
  0x21   :  { %448 = shalt.err (!%p445_p1)
}
  0x22   :  { %24 = dma.hbm_to_vmem [thread:$0]  %s563_s0, 64, %s22_s8, [#allocation3]  }
  0x23   :  { %s449_s22 = scalar_lea.hbm %s566_s3, 1024 }
  0x24   :  { %p450_p2 = scmp.ne.s32.totalorder %s566_s3, %s449_s22  ;;  %p453_p3 = scmp.lt.u32.totalorder %s449_s22, %s566_s3 }
  0x26   :  { %p455_p4 = pnand %p453_p3, %p450_p2 }
  0x28   :  { %458 = shalt.err (!%p455_p4)
}
  0x29   :  { %s459_s27 = scalar_lea.vmem %s45_s10, 1024  ;;  %p464_p6 = scmp.lt.s32.totalorder %s45_s10, %s45_s10 }
  0x2a   :  { %p460_p5 = scmp.ne.s32.totalorder %s45_s10, %s459_s27  ;;  %p465_p7 = scmp.lt.s32.totalorder %s459_s27, %s459_s27 }
  0x2c   :  { %p466_p8 = por %p465_p7, %p464_p6 }
  0x2e   :  { %p467_p9 = pnand %p466_p8, %p460_p5 }
  0x30   :  { %470 = shalt.err (!%p467_p9)
}
  0x31   :  { %50 = dma.hbm_to_vmem [thread:$0]  %s566_s3, 1024, %s45_s10, [#allocation5], %s476_s28, %s476_s28, %s477_s29  }
  0x32   :  { %471 = dma.done.wait [#allocation3], 64  }
  0x33   :  { %472 = vsyncadd [#allocation3], 4294967232 }
  0x34   :  { %473 = dma.done.wait [#allocation5], 2048  }
  0x35   :  { %474 = vsyncadd [#allocation5], 4294965248  ;;  %v480_v0 = vmov 0.0   ;;  %vm481_vm0 = vmmov 0   ;;  %v389_v1 = vld [vmem:[#allocation4] sm:$0xff]   ;;  %v390_v2 = vld [vmem:[#allocation4 + $0x8] sm:$0xff]  }
  0x36   :  { %342 = vmatprep.subr.bf16.mxu0 %v480_v0  ;;  %358 = vmatprep.mubr.msk.bf16.mxu0 %vm481_vm0, %v480_v0  ;;  %v391_v3 = vld [vmem:[#allocation4 + $0x10] sm:$0xff]   ;;  %v397_v4 = vld [vmem:[#allocation6] sm:$0xff]   ;;  %v392_v5 = vld [vmem:[#allocation4 + $0x18] sm:$0xff]  }
  0x37   :  { %362 = vmatprep.subr.bf16.mxu1 %v480_v0  ;;  %378 = vmatprep.mubr.msk.bf16.mxu1 %vm481_vm0, %v480_v0  ;;  %v398_v6 = vld [vmem:[#allocation6 + $0x8] sm:$0xff]   ;;  %v393_v7 = vld [vmem:[#allocation4 + $0x20] sm:$0xff]   ;;  %v399_v8 = vld [vmem:[#allocation6 + $0x10] sm:$0xff]  }
  0x38   :  { %343 = vmatpush3.bf16.msra.mxu0 %v389_v1  ;;  %363 = vmatpush3.bf16.msra.mxu1 %v397_v4  ;;  %v394_v9 = vld [vmem:[#allocation4 + $0x28] sm:$0xff]   ;;  %v400_v10 = vld [vmem:[#allocation6 + $0x18] sm:$0xff]   ;;  %v395_v11 = vld [vmem:[#allocation4 + $0x30] sm:$0xff]  }
  0x39   :  { %344 = vmatprep.subr.bf16.mxu0 %v480_v0  ;;  %364 = vmatprep.subr.bf16.mxu1 %v480_v0  ;;  %v401_v12 = vld [vmem:[#allocation6 + $0x20] sm:$0xff]   ;;  %v396_v13 = vld [vmem:[#allocation4 + $0x38] sm:$0xff]   ;;  %v402_v14 = vld [vmem:[#allocation6 + $0x28] sm:$0xff]  }
  0x3a   :  { %v69_v15 = vld [vmem:[#allocation2] sm:$0xf]  ;;  %v403_v16 = vld [vmem:[#allocation6 + $0x30] sm:$0xff]  }
  0x3b   :  { %v404_v17 = vld [vmem:[#allocation6 + $0x38] sm:$0xff]   ;;  %v294_v27 = vunpack.c.l.bf16 %v69_v15 }
  0x3c   :  { %345 = vmatpush3.bf16.msra.mxu0 %v390_v2  ;;  %365 = vmatpush3.bf16.msra.mxu1 %v398_v6  ;;  %v306_v18 = vld [vmem:[%s565_s2] ss:$0 sm:$0xff] }
  0x3d   :  { %346 = vmatprep.subr.bf16.mxu0 %v480_v0  ;;  %366 = vmatprep.subr.bf16.mxu1 %v480_v0  ;;  %v315_v26 = vld [vmem:[%s567_s4] ss:$0 sm:$0xff] }
  0x40   :  { %347 = vmatpush3.bf16.msra.mxu0 %v391_v3  ;;  %367 = vmatpush3.bf16.msra.mxu1 %v399_v8 }
  0x41   :  { %348 = vmatprep.subr.bf16.mxu0 %v480_v0  ;;  %368 = vmatprep.subr.bf16.mxu1 %v480_v0 }
  0x44   :  { %349 = vmatpush3.bf16.msra.mxu0 %v392_v5  ;;  %369 = vmatpush3.bf16.msra.mxu1 %v400_v10 }
  0x45   :  { %350 = vmatprep.subr.bf16.mxu0 %v480_v0  ;;  %370 = vmatprep.subr.bf16.mxu1 %v480_v0 }
  0x48   :  { %351 = vmatpush3.bf16.msra.mxu0 %v393_v7  ;;  %371 = vmatpush3.bf16.msra.mxu1 %v401_v12 }
  0x49   :  { %352 = vmatprep.subr.bf16.mxu0 %v480_v0  ;;  %372 = vmatprep.subr.bf16.mxu1 %v480_v0 }
  0x4c   :  { %353 = vmatpush3.bf16.msra.mxu0 %v394_v9  ;;  %373 = vmatpush3.bf16.msra.mxu1 %v402_v14 }
  0x4d   :  { %354 = vmatprep.subr.bf16.mxu0 %v480_v0  ;;  %374 = vmatprep.subr.bf16.mxu1 %v480_v0 }
  0x50   :  { %355 = vmatpush3.bf16.msra.mxu0 %v395_v11  ;;  %375 = vmatpush3.bf16.msra.mxu1 %v403_v16 }
  0x51   :  { %356 = vmatprep.subr.bf16.mxu0 %v480_v0  ;;  %376 = vmatprep.subr.bf16.mxu1 %v480_v0 }
  0x54   :  { %357 = vmatpush3.bf16.msra.mxu0 %v396_v13  ;;  %377 = vmatpush3.bf16.msra.mxu1 %v404_v17 }
  0x57   :  { %359 = vmatmul.mubr.bf16.vlgmr.msra.gmra.mrb[0].mxu0 %v69_v15 }
 0x12a   :  { %v175_v19 = vpop.f32.mrb[0].mxu0 }
 0x12b   :  { %v176_v20 = vadd.f32 %v306_v18, %v175_v19  ;;  %v360_v21 = vpop.f32.mrb[1].mxu0 }
 0x12c   :  { %v178_v22 = vpop.f32.mrb[2].mxu0 }
 0x12d   :  { %v181_v23 = vmax.f32 %v176_v20, 0.0  ;;  %v361_v24 = vpop.f32.mrb[3].mxu0 }
 0x12f   :  { %v199_v25 = vpack.c.bf16 %v181_v23, %v181_v23 }
 0x131   :  { %379 = vmatmul.mubr.bf16.vlgmr.msra.gmra.mrb[0].mxu1 %v199_v25 }
 0x204   :  { %v288_v28 = vpop.f32.mrb[0].mxu1 }
 0x205   :  { %v289_v29 = vadd.f32 %v315_v26, %v288_v28  ;;  %v380_v30 = vpop.f32.mrb[1].mxu1 }
 0x206   :  { %v291_v31 = vpop.f32.mrb[2].mxu1 }
 0x207   :  { %v295_v32 = vsub.f32 %v289_v29, %v294_v27  ;;  %v381_v33 = vpop.f32.mrb[3].mxu1 }
 0x209   :  { %v297_v34 = vmul.f32 %v295_v32, %v295_v32 }
 0x20b   :  { %299 = vst [vmem:[%s568_s5] sm:$0xff] %v297_v34 }
 0x20c   :  { %304 = vsyncpa [#allocation3], 1 }
 0x20d   :  { %305 = vsyncpa [#allocation5], 1 }

</bundles_post_ra>
